<compile_context>
chip_gen: v7x
topology: tpu7x:2x2x1
jax: 0.10.0
libtpu: 0.0.40
codegen_flags: <defaults>
</compile_context>

<pallas_src>
import numpy as np
import jax
import jax.numpy as jnp
from jax.experimental import pallas as pl
from jax.experimental.pallas import tpu as pltpu

NEG_SLOPE = 0.2
BN_EPS = 1e-5


def _conv_stats_kernel(x_ref, w_ref, z_ref, sum_ref, ssq_ref):
    """Per-batch 'same' Conv1d + partial BatchNorm statistics.

    x_ref   : (1, T, D)   channels-last input tile for batch b
    w_ref   : (K, C, D)   conv taps, resident across the grid
    z_ref   : (1, C, T)   pre-BN conv output tile (f32)
    sum_ref : (1, C, 1)   per-batch  sum_t z[c, t]
    ssq_ref : (1, C, 1)   per-batch  sum_t z[c, t]^2
    """
    _, T, D = x_ref.shape
    K, _, _ = w_ref.shape
    left = (K - 1) // 2                      # PyTorch 'same' (stride=1, dilation=1)

    xb = x_ref[0]                            # (T, D)
    row = jax.lax.broadcasted_iota(jnp.int32, (T, D), 0)

    acc = None
    for k in range(K):                       # static unroll (tiny K)
        s = k - left                         # want x_shift[t] = x[t + s] (0 outside)
        if s == 0:
            xk = xb
        else:
            rolled = pltpu.roll(xb, shift=(-s) % T, axis=0)   # XLU rotation
            if s > 0:
                mask = row < (T - s)
            else:
                mask = row >= (-s)
            xk = jnp.where(mask, rolled, jnp.zeros_like(rolled))
        zk = jax.lax.dot_general(            # (C, D) x (T, D) -> (C, T) on the MXU
            w_ref[k], xk,
            dimension_numbers=(((1,), (1,)), ((), ())),
            preferred_element_type=jnp.float32)
        acc = zk if acc is None else acc + zk

    z_ref[0] = acc
    sum_ref[0] = jnp.sum(acc, axis=1, keepdims=True)
    ssq_ref[0] = jnp.sum(acc * acc, axis=1, keepdims=True)


def _bn_act_kernel(z_ref, scale_ref, shift_ref, o_ref):
    """Fused BatchNorm affine + LeakyReLU(0.2) on one (C, tT) tile."""
    y = z_ref[0] * scale_ref[...] + shift_ref[...]     # (C, tT)*(C, 1) + (C, 1)
    o_ref[0] = jnp.where(y >= 0, y, NEG_SLOPE * y).astype(o_ref.dtype)


def _pick_t_tile(T):
    for cand in (512, 256, 128):
        if T % cand == 0:
            return cand
    return T


def c1d_forward(x, w_cdk, gamma, beta):
    """x: (B, T, D); w_cdk: (C, D, K) PyTorch Conv1d weight; gamma/beta: (C,)."""
    B, T, D = x.shape
    C, D2, K = w_cdk.shape
    assert D == D2

    # (C, D, K) -> (K, C, D): tap k is a clean sublane slab w_ref[k] = (C, D).
    w_kcd = jnp.transpose(w_cdk, (2, 0, 1)).astype(x.dtype)
    itemsize = jnp.dtype(x.dtype).itemsize

    # ---- pass 1: conv + per-batch partial BN stats (grid over B, parallel) ----
    # TODO(synk): add a T-tiling grid axis with a (K-1)-row halo for very large
    #   T / very small B so the pipeline has more stages and the per-step tile
    #   stays well under v7x VMEM.
    z, psum, psq = pl.pallas_call(
        _conv_stats_kernel,
        out_shape=(
            jax.ShapeDtypeStruct((B, C, T), jnp.float32),
            jax.ShapeDtypeStruct((B, C, 1), jnp.float32),
            jax.ShapeDtypeStruct((B, C, 1), jnp.float32),
        ),
        grid_spec=pltpu.PrefetchScalarGridSpec(
            num_scalar_prefetch=0,
            grid=(B,),
            in_specs=[
                pl.BlockSpec((1, T, D), lambda b: (b, 0, 0)),     # per-batch tile
                pl.BlockSpec((K, C, D), lambda b: (0, 0, 0)),     # weights resident
            ],
            out_specs=[
                pl.BlockSpec((1, C, T), lambda b: (b, 0, 0)),
                pl.BlockSpec((1, C, 1), lambda b: (b, 0, 0)),
                pl.BlockSpec((1, C, 1), lambda b: (b, 0, 0)),
            ],
        ),
        compiler_params=pltpu.CompilerParams(
            dimension_semantics=("parallel",)),
        cost_estimate=pl.CostEstimate(
            flops=2 * B * C * T * K * D,
            transcendentals=0,
            bytes_accessed=(B * T * D + K * C * D) * itemsize
                           + (B * C * T + 2 * B * C) * 4),
    )(x, w_kcd)

    # ---- tiny cross-batch reduction -> BN scale/shift (O(B*C) wrapper glue) ----
    # TODO(synk): E[x^2]-E[x]^2 in f32 can cancel for huge-magnitude activations;
    #   switch to a shifted/Welford accumulation if that matters at scale.
    n = float(B * T)
    mean = jnp.sum(psum[:, :, 0], axis=0) / n                  # (C,)
    var = jnp.sum(psq[:, :, 0], axis=0) / n - mean * mean      # biased variance
    scale = gamma.astype(jnp.float32) * jax.lax.rsqrt(var + BN_EPS)
    shift = beta.astype(jnp.float32) - mean * scale
    scale_c1 = scale.reshape(C, 1)
    shift_c1 = shift.reshape(C, 1)

    # ---- pass 2: BN affine + LeakyReLU (grid over B x T-tiles, parallel) ----
    tT = _pick_t_tile(T)
    nT = T // tT
    out_dtype = x.dtype
    out_bct = pl.pallas_call(
        _bn_act_kernel,
        out_shape=jax.ShapeDtypeStruct((B, C, T), out_dtype),
        grid_spec=pltpu.PrefetchScalarGridSpec(
            num_scalar_prefetch=0,
            grid=(B, nT),
            in_specs=[
                pl.BlockSpec((1, C, tT), lambda b, t: (b, 0, t)),
                pl.BlockSpec((C, 1), lambda b, t: (0, 0)),
                pl.BlockSpec((C, 1), lambda b, t: (0, 0)),
            ],
            out_specs=pl.BlockSpec((1, C, tT), lambda b, t: (b, 0, t)),
        ),
        compiler_params=pltpu.CompilerParams(
            dimension_semantics=("parallel", "parallel")),
        cost_estimate=pl.CostEstimate(
            flops=4 * B * C * T,
            transcendentals=0,
            bytes_accessed=B * C * T * 4
                           + B * C * T * jnp.dtype(out_dtype).itemsize
                           + 2 * C * 4),
    )(z, scale_c1, shift_c1)

    # PyTorch tail: LeakyReLU preserves the permuted (channels-first) memory
    # layout, so `.permute(0,2,1).view(B,-1,T,C).squeeze(1)` is a RAW row-major
    # reinterpretation of the (B, C, T) buffer as (B, T, C) -- a free reshape
    # here (not a transpose).  The pure-JAX reference below uses the same map.
    return out_bct.reshape(B, T, C)


def ref_forward(x, w_cdk, gamma, beta):
    """Pure-JAX reference mirroring the PyTorch module semantics (f32)."""
    B, T, D = x.shape
    C, _, K = w_cdk.shape
    left = (K - 1) // 2
    xp = jnp.pad(x.astype(jnp.float32), ((0, 0), (left, (K - 1) - left), (0, 0)))
    z = jnp.zeros((B, C, T), jnp.float32)
    for k in range(K):
        z = z + jnp.einsum('btd,cd->bct', xp[:, k:k + T, :],
                           w_cdk[:, :, k].astype(jnp.float32))
    mean = z.mean(axis=(0, 2), keepdims=True)
    var = ((z - mean) ** 2).mean(axis=(0, 2), keepdims=True)
    zn = (z - mean) / jnp.sqrt(var + BN_EPS)
    zn = zn * gamma.reshape(1, C, 1) + beta.reshape(1, C, 1)
    a = jnp.where(zn >= 0, zn, NEG_SLOPE * zn)                 # (B, C, T)
    return a.reshape(B, T, C)                                  # raw-reshape tail


if __name__ == "__main__":
    B, T, D, C, K = 2, 16, 4, 8, 3
    key = jax.random.PRNGKey(0)
    kx, kw, kg, kb = jax.random.split(key, 4)
    x = jax.random.normal(kx, (B, T, D), jnp.float32)
    # Conv1d weight in PyTorch layout (C_out, C_in, K), no bias.
    bound = 1.0 / float(np.sqrt(D * K))
    w = jax.random.uniform(kw, (C, D, K), jnp.float32, -bound, bound)
    # Non-trivial BatchNorm affine params to exercise the scale/shift path.
    gamma = jax.random.uniform(kg, (C,), jnp.float32, 0.5, 1.5)
    beta = 0.1 * jax.random.normal(kb, (C,), jnp.float32)

    out = jax.block_until_ready(c1d_forward(x, w, gamma, beta))
    ref = jax.block_until_ready(ref_forward(x, w, gamma, beta))

    assert out.shape == (B, T, C)
    np.testing.assert_allclose(np.asarray(out), np.asarray(ref), rtol=2e-3, atol=2e-3)
    print("KERNEL_OK")
</pallas_src>

<mosaic_0001>
module attributes {stable_mosaic.version = 11 : i64} {
  func.func @_conv_stats_kernel(%arg0: i32, %arg1: memref<1x16x4xf32, #tpu.memory_space<vmem>>, %arg2: memref<3x8x4xf32, #tpu.memory_space<vmem>>, %arg3: memref<1x8x16xf32, #tpu.memory_space<vmem>>, %arg4: memref<1x8x1xf32, #tpu.memory_space<vmem>>, %arg5: memref<1x8x1xf32, #tpu.memory_space<vmem>>) attributes {dimension_semantics = [#tpu.dimension_semantics<parallel>], iteration_bounds = array<i64: 2>, scalar_prefetch = 0 : i64, scratch_operands = 0 : i64, tpu.core_type = #tpu.core_type<tc>, window_params = [{transform_indices = @transform_0, window_bounds = array<i64: 1, 16, 4>}, {pipeline_mode = #tpu.pipeline_mode<synchronous>, transform_indices = @transform_1, window_bounds = array<i64: 3, 8, 4>}, {transform_indices = @transform_2, window_bounds = array<i64: 1, 8, 16>}, {transform_indices = @transform_3, window_bounds = array<i64: 1, 8, 1>}, {transform_indices = @transform_4, window_bounds = array<i64: 1, 8, 1>}]} {
    %c0 = arith.constant 0 : index
    %c0_0 = arith.constant 0 : index
    %c0_1 = arith.constant 0 : index
    %0 = vector.load %arg1[%c0, %c0_0, %c0_1] : memref<1x16x4xf32, #tpu.memory_space<vmem>>, vector<1x16x4xf32>
    %1 = vector.shape_cast %0 : vector<1x16x4xf32> to vector<16x4xf32>
    %2 = tpu.iota {dimensions = array<i32: 0>} : vector<16x4xi32>
    %c1_i32 = arith.constant 1 : i32
    %3 = tpu.dynamic_rotate %1 by %c1_i32 dim 0 : vector<16x4xf32>, i32 -> vector<16x4xf32>
    %c1_i32_2 = arith.constant 1 : i32
    %4 = vector.broadcast %c1_i32_2 : i32 to vector<16x4xi32>
    %5 = arith.cmpi sge, %2, %4 : vector<16x4xi32>
    %cst = arith.constant 0.000000e+00 : f32
    %6 = vector.broadcast %cst : f32 to vector<16x4xf32>
    %7 = arith.select %5, %3, %6 : vector<16x4xi1>, vector<16x4xf32>
    %c0_3 = arith.constant 0 : index
    %c0_4 = arith.constant 0 : index
    %c0_5 = arith.constant 0 : index
    %8 = vector.load %arg2[%c0_3, %c0_4, %c0_5] : memref<3x8x4xf32, #tpu.memory_space<vmem>>, vector<1x8x4xf32>
    %9 = vector.shape_cast %8 : vector<1x8x4xf32> to vector<8x4xf32>
    %cst_6 = arith.constant dense<0.000000e+00> : vector<8x16xf32>
    %10 = tpu.matmul %9, %7, %cst_6 {dimension_numbers = #tpu.dot_dimension_numbers<[1], [1], [0], [0], [0, 0, 1, 0], [], []>} : vector<8x4xf32>, vector<16x4xf32>, vector<8x16xf32> -> vector<8x16xf32>
    %c1 = arith.constant 1 : index
    %c0_7 = arith.constant 0 : index
    %c0_8 = arith.constant 0 : index
    %11 = vector.load %arg2[%c1, %c0_7, %c0_8] : memref<3x8x4xf32, #tpu.memory_space<vmem>>, vector<1x8x4xf32>
    %12 = vector.shape_cast %11 : vector<1x8x4xf32> to vector<8x4xf32>
    %cst_9 = arith.constant dense<0.000000e+00> : vector<8x16xf32>
    %13 = tpu.matmul %12, %1, %cst_9 {dimension_numbers = #tpu.dot_dimension_numbers<[1], [1], [0], [0], [0, 0, 1, 0], [], []>} : vector<8x4xf32>, vector<16x4xf32>, vector<8x16xf32> -> vector<8x16xf32>
    %14 = arith.addf %10, %13 : vector<8x16xf32>
    %c15_i32 = arith.constant 15 : i32
    %15 = tpu.dynamic_rotate %1 by %c15_i32 dim 0 : vector<16x4xf32>, i32 -> vector<16x4xf32>
    %c15_i32_10 = arith.constant 15 : i32
    %16 = vector.broadcast %c15_i32_10 : i32 to vector<16x4xi32>
    %17 = arith.cmpi slt, %2, %16 : vector<16x4xi32>
    %cst_11 = arith.constant 0.000000e+00 : f32
    %18 = vector.broadcast %cst_11 : f32 to vector<16x4xf32>
    %19 = arith.select %17, %15, %18 : vector<16x4xi1>, vector<16x4xf32>
    %c2 = arith.constant 2 : index
    %c0_12 = arith.constant 0 : index
    %c0_13 = arith.constant 0 : index
    %20 = vector.load %arg2[%c2, %c0_12, %c0_13] : memref<3x8x4xf32, #tpu.memory_space<vmem>>, vector<1x8x4xf32>
    %21 = vector.shape_cast %20 : vector<1x8x4xf32> to vector<8x4xf32>
    %cst_14 = arith.constant dense<0.000000e+00> : vector<8x16xf32>
    %22 = tpu.matmul %21, %19, %cst_14 {dimension_numbers = #tpu.dot_dimension_numbers<[1], [1], [0], [0], [0, 0, 1, 0], [], []>} : vector<8x4xf32>, vector<16x4xf32>, vector<8x16xf32> -> vector<8x16xf32>
    %23 = arith.addf %14, %22 : vector<8x16xf32>
    %c0_15 = arith.constant 0 : index
    %c0_16 = arith.constant 0 : index
    %c0_17 = arith.constant 0 : index
    %24 = vector.load %arg3[%c0_15, %c0_16, %c0_17] : memref<1x8x16xf32, #tpu.memory_space<vmem>>, vector<1x8x16xf32>
    %25 = vector.shape_cast %24 : vector<1x8x16xf32> to vector<8x16xf32>
    %26 = vector.shape_cast %23 : vector<8x16xf32> to vector<1x8x16xf32>
    tpu.vector_store %arg3[%c0_15, %c0_16, %c0_17], %26 {strides = array<i32>} : memref<1x8x16xf32, #tpu.memory_space<vmem>>, vector<1x8x16xf32>,
    %cst_18 = arith.constant dense<0.000000e+00> : vector<8xf32>
    %27 = vector.multi_reduction <add>, %23, %cst_18 [1] : vector<8x16xf32> to vector<8xf32>
    %28 = vector.shape_cast %27 : vector<8xf32> to vector<8x1xf32>
    %c0_19 = arith.constant 0 : index
    %c0_20 = arith.constant 0 : index
    %c0_21 = arith.constant 0 : index
    %29 = vector.load %arg4[%c0_19, %c0_20, %c0_21] : memref<1x8x1xf32, #tpu.memory_space<vmem>>, vector<1x8x1xf32>
    %30 = vector.shape_cast %29 : vector<1x8x1xf32> to vector<8x1xf32>
    %31 = vector.shape_cast %28 : vector<8x1xf32> to vector<1x8x1xf32>
    tpu.vector_store %arg4[%c0_19, %c0_20, %c0_21], %31 {strides = array<i32>} : memref<1x8x1xf32, #tpu.memory_space<vmem>>, vector<1x8x1xf32>,
    %32 = arith.mulf %23, %23 : vector<8x16xf32>
    %cst_22 = arith.constant dense<0.000000e+00> : vector<8xf32>
    %33 = vector.multi_reduction <add>, %32, %cst_22 [1] : vector<8x16xf32> to vector<8xf32>
    %34 = vector.shape_cast %33 : vector<8xf32> to vector<8x1xf32>
    %c0_23 = arith.constant 0 : index
    %c0_24 = arith.constant 0 : index
    %c0_25 = arith.constant 0 : index
    %35 = vector.load %arg5[%c0_23, %c0_24, %c0_25] : memref<1x8x1xf32, #tpu.memory_space<vmem>>, vector<1x8x1xf32>
    %36 = vector.shape_cast %35 : vector<1x8x1xf32> to vector<8x1xf32>
    %37 = vector.shape_cast %34 : vector<8x1xf32> to vector<1x8x1xf32>
    tpu.vector_store %arg5[%c0_23, %c0_24, %c0_25], %37 {strides = array<i32>} : memref<1x8x1xf32, #tpu.memory_space<vmem>>, vector<1x8x1xf32>,
    return
  }
  func.func @transform_0(%arg0: i32) -> (i32, i32, i32) {
    %c0_i32 = arith.constant 0 : i32
    %c0_i32_0 = arith.constant 0 : i32
    %c0_i32_1 = arith.constant 0 : i32
    return %arg0, %c0_i32, %c0_i32_0 : i32, i32, i32
  }
  func.func @transform_1(%arg0: i32) -> (i32, i32, i32) {
    %c0_i32 = arith.constant 0 : i32
    %c0_i32_0 = arith.constant 0 : i32
    %c0_i32_1 = arith.constant 0 : i32
    %c0_i32_2 = arith.constant 0 : i32
    return %c0_i32, %c0_i32_0, %c0_i32_1 : i32, i32, i32
  }
  func.func @transform_2(%arg0: i32) -> (i32, i32, i32) {
    %c0_i32 = arith.constant 0 : i32
    %c0_i32_0 = arith.constant 0 : i32
    %c0_i32_1 = arith.constant 0 : i32
    return %arg0, %c0_i32, %c0_i32_0 : i32, i32, i32
  }
  func.func @transform_3(%arg0: i32) -> (i32, i32, i32) {
    %c0_i32 = arith.constant 0 : i32
    %c0_i32_0 = arith.constant 0 : i32
    %c0_i32_1 = arith.constant 0 : i32
    return %arg0, %c0_i32, %c0_i32_0 : i32, i32, i32
  }
  func.func @transform_4(%arg0: i32) -> (i32, i32, i32) {
    %c0_i32 = arith.constant 0 : i32
    %c0_i32_0 = arith.constant 0 : i32
    %c0_i32_1 = arith.constant 0 : i32
    return %arg0, %c0_i32, %c0_i32_0 : i32, i32, i32
  }
}

</mosaic_0001>

<bundles_post_ra>
// kernel: tpu_custom_call.1
= control target key start
LH: loop header
LB: loop body
LE: loop exit
PB: predicated region body
PF: predicated region fallthrough
CT: control target
= control target key end

     0   :  { %10 = vsyncpa [#allocation3], 0  ;;  %s957_s0 = inlined_call_operand.vmem [shape: f32[2,16,4], index: 0, kind: input, shape index: {}]   ;;  %s958_s1 = inlined_call_operand.vmem [shape: f32[3,8,4], index: 1, kind: input, shape index: {}]   ;;  %s959_s2 = inlined_call_operand.hbm [shape: f32[2,8,16], index: 2, kind: output, shape index: {0}]   ;;  %s960_s3 = inlined_call_operand.vmem [shape: f32[2,8,1], index: 3, kind: output, shape index: {1}]   ;;  %s961_s4 = inlined_call_operand.vmem [shape: f32[2,8,1], index: 4, kind: output, shape index: {2}]  }
   0x1   :  { %12 = vsyncpa [#allocation3 + $0x1], 0  ;;  %s836_s15 = smov 0   ;;  %s838_s16 = smov 0  }
   0x2   :  { %s840_s17 = smov 0   ;;  %s842_s18 = smov 0  }
   0x3 LB: > { %s857_s19 = sadd.s32 4294967295, %s805_s18   ;;  %s631_s20 = sadd.s32 4294967294, %s805_s18   ;;  %s805_s18 = sphi %s842_s18, %s967_s18   ;;  %s801_s17 = sphi %s840_s17, %s966_s17   ;;  %s797_s16 = sphi %s838_s16, %s965_s16   ;;  %s793_s15 = sphi %s836_s15, %s964_s15  }
   0x4   : > { %s861_s21 = sadd.s32 1, %s805_s18   ;;  %s72_s22 = sadd.s32 1, %s801_s17 }
   0x5   : > { %s69_s23 = ssub.s32 %s805_s18, %s861_s21  ;;  %p82_p0 = scmp.ne.s32.totalorder %s801_s17, %s797_s16 }
   0x6   : > { %p70_p1 = scmp.eq.s32.totalorder %s69_s23, 0  ;;  %p83_p2 = scmp.eq.s32.totalorder %s857_s19, 1 }
   0x7   : > { %p88_p3 = scmp.ne.s32.totalorder %s797_s16, %s793_s15  ;;  %p89_p4 = scmp.eq.s32.totalorder %s631_s20, 1 }
   0x8   : > { %s872_s24 = scalar_select %p70_p1, %s801_s17, %s72_s22  }
   0x9   : > { %p874_p5 = por %p83_p2, %p82_p0  ;;  %p878_p6 = por %p89_p4, %p88_p3 }
   0xa   : > { %p634_p7 = scmp.ge.s32.totalorder %s805_s18, 1  ;;  %p170_p8 = scmp.lt.s32.totalorder %s805_s18, 3 }
   0xc   : > { %p171_p9 = pnand %p634_p7, %p170_p8 }
   0xd   : > { %p204_p10 = scmp.lt.s32.totalorder (!%p171_p9), %s857_s19, 1  ;;  %v219_v0 = vlaneseq (!%p171_p9)  ;;  %v807_v1 = vmov (!%p171_p9), 0.0|0.0   ;;  %vm808_vm0 = vmmov (!%p171_p9), 0   ;;  %v809_v3 = vmov (!%p171_p9), 0.0   ;;  %v640_v19 = vld [vmem:[%s958_s1 + $0x8] sm:$0xff] (!%p171_p9)  ;;  %v231_v20 = vld [vmem:[%s958_s1] sm:$0xff] (!%p171_p9) }
   0xe   : > { %174 = sbr.rel (%p171_p9) target bundleno = 409 (0x199), region = 28  ;;  %690 = vmatprep.subr.bf16.mxu0 (!%p171_p9), %v807_v1  ;;  %686 = vmatprep.subr.bf16.mxu1 (!%p171_p9), %v807_v1  ;;  %vm234_vm3 = vcmask (!%p171_p9), 31744   ;;  %v647_v22 = vld [vmem:[%s958_s1 + $0x10] sm:$0xff] (!%p171_p9)  ;;  %s189_s12 = sand.u32 (!%p171_p9), 1, %s797_s16   ;;  %vm484_vm7 = vcmask (!%p171_p9), 130048  }
   0xf   : > { %v220_v2 = vshrl.u32 (!%p171_p9), %v219_v0, 7  ;;  %676 = vmatprep.mubr.msk.f32.mxu0 (!%p171_p9), %vm808_vm0, %v809_v3  ;;  %669 = vmatprep.mubr.msk.f32.mxu1 (!%p171_p9), %vm808_vm0, %v809_v3  ;;  %vm688_vm5 = vmpackc.low (!%p171_p9), %vm234_vm3, %vm234_vm3  ;;  %s635_s13 = sshll.u32 (!%p171_p9), %s189_s12, 3  ;;  %s652_s20 = sshll.u32 (!%p171_p9), %s857_s19, 7 }
  0x10   : > { %s191_s14 = scalar_lea.vmem (!%p171_p9), [#allocation2], %s635_s13  ;;  %s914_s29 = scalar_lea.hbm (!%p171_p9), %s959_s2, %s652_s20 }
  0x11   : > { %vm224_vm1 = vcmp.lt.s32.totalorder (!%p171_p9), %v220_v2, 1  ;;  %vm227_vm2 = vcmp.ge.s32.totalorder (!%p171_p9), %v220_v2, 1  ;;  %v221_v6 = vadd.s32 (!%p171_p9), 8, %v220_v2  ;;  %vm395_vm4 = vcmp.lt.s32.totalorder (!%p171_p9), %v220_v2, 7  ;;  %s518_s22 = sshll.u32 (!%p171_p9), %s191_s14, 4  ;;  %s497_s30 = scalar_lea.sflag (!%p171_p9), [#allocation3], %s189_s12  ;;  %s519_s22 = int_to_ptr.vmem [resolvable:$true] %s518_s22 }
  0x12   : > { %s810_s6 = smov (!%p171_p9), [#allocation2]  }
  0x13   : > { %vm399_vm6 = vcmp.lt.s32.totalorder (!%p171_p9), %v221_v6, 15  ;;  %s747_s7 = sshll.u32 (!%p171_p9), %s810_s6, 4  ;;  %s748_s7 = int_to_ptr.vmem [resolvable:$false] %s747_s7 }
  0x14   : > { %s749_s8 = scalar_lea.vmem (!%p171_p9), %s748_s7, 256  ;;  %p750_p0 = scmp.lt.s32.totalorder (!%p171_p9), %s519_s22, %s748_s7 }
  0x15   : > { %s886_s27 = scalar_select %p204_p10, %s857_s19, 1 }
  0x17   : > { %s655_s28 = sshll.u32 %s886_s27, 4 }
  0x18   : > { %s208_s5 = scalar_lea.vmem %s957_s0, %s655_s28 }
  0x19   : > { %v217_v4 = vld [vmem:[%s208_s5] sm:$0xff]  ;;  %v218_v5 = vld [vmem:[%s208_s5 + $0x8] sm:$0xff]  ;;  %s743_s5 = scalar_lea.vmem %s519_s22, 128 }
  0x1a   : > { %v222_v7 = vrot.slane %v217_v4, 7  ;;  %v223_v8 = vrot.slane %v218_v5, 7  ;;  %v393_v9 = vrot.slane %v217_v4, 1  ;;  %v394_v10 = vrot.slane %v218_v5, 1  ;;  %p744_p11 = scmp.ne.s32.totalorder %s519_s22, %s743_s5  ;;  %p751_p1 = scmp.lt.s32.totalorder %s749_s8, %s743_s5 }
  0x1b   : > { %v687_v11 = vpack.c.bf16 %v218_v5, %v217_v4 }
  0x1c   : > { %v225_v12 = vsel %vm224_vm1, %v222_v7, %v223_v8  ;;  %v226_v13 = vsel %vm224_vm1, %v223_v8, %v222_v7  ;;  %v397_v16 = vsel %vm395_vm4, %v394_v10, %v393_v9  ;;  %v396_v17 = vsel %vm395_vm4, %v393_v9, %v394_v10  ;;  %p745_p12 = pnand %p744_p11, %p874_p5  ;;  %p752_p2 = por %p751_p1, %p750_p0 }
  0x1d   : > { %v229_v14 = vsel %vm227_vm2, %v226_v13, 0.0  ;;  %689 = vmatpush3.bf16.xpose.msk.msra.mxu1 %vm688_vm5, %v687_v11  ;;  %v401_v18 = vsel %vm399_vm6, %v397_v16, 0.0 }
  0x1e   : > { %v691_v15 = vpack.c.bf16 %v225_v12, %v229_v14  ;;  %v695_v21 = vpack.c.bf16 %v401_v18, %v396_v17  ;;  %p746_p13 = pneg %p745_p12 }
  0x20   : > { %693 = vmatpush3.bf16.xpose.msk.msra.mxu0 %vm688_vm5, %v691_v15  ;;  %p753_p3 = pnand %p752_p2, %p746_p13 }
  0x21   : > { %694 = vmatprep.subr.bf16.mxu0 %v807_v1 }
  0x24   : > { %670 = vmatmul.mubr.msk.f32.vlgmr.msra.gmra.mrb[0].mxu1 %vm234_vm3, %v640_v19 }
  0x27   : > { %677 = vmatmul.mubr.msk.f32.vlgmr.msra.gmra.mrb[0].mxu0 %vm234_vm3, %v231_v20 }
  0x28   : > { %697 = vmatpush3.bf16.xpose.msk.msra.mxu0 %vm688_vm5, %v695_v21  ;;  %683 = vmatprep.mubr.msk.f32.mxu0 %vm808_vm0, %v809_v3 }
  0x2f   : > { %684 = vmatmul.mubr.msk.f32.vlgmr.msra.gmra.mrb[0].mxu0 %vm234_vm3, %v647_v22 }
  0xf7   : > { %v310_v23 = vpop.f32.mrb[0].mxu1 }
  0xf8   : > { %v671_v24 = vpop.f32.mrb[1].mxu1 }
 0x102   : > { %v479_v25 = vpop.f32.mrb[0].mxu0 }
 0x103   : > { %v698_v26 = vadd.f32 %v479_v25, %v310_v23  ;;  %v685_v27 = vpop.f32.mrb[1].mxu0 }
 0x105   : > { %v486_v28 = vsel %vm484_vm7, %v698_v26, 0.0  ;;  %v491_v29 = vmul.f32 %v698_v26, %v698_v26  ;;  %485 = vst.msk [vmem:[%s191_s14] sm:$0xff] %vm484_vm7, %v698_v26 }
 0x106   : > { %487 = vadd.xlane.f32.xlu0 %v486_v28 }
 0x107   : > { %v492_v30 = vsel %vm484_vm7, %v491_v29, 0.0 }
 0x10a   : > { %493 = vadd.xlane.f32.xlu0 %v492_v30 }
 0x10b   : > { %756 = shalt.err (!%p753_p3)
}
 0x10c   : > { %s757_s19 = scalar_lea.hbm %s914_s29, 128  ;;  %s761_s11 = scalar_lea.hbm %s959_s2, 256 }
 0x10d   : > { %p758_p4 = scmp.ne.s32.totalorder %s914_s29, %s757_s19  ;;  %p762_p9 = scmp.lt.u32.totalorder %s914_s29, %s959_s2 }
 0x10e   : > { %p763_p10 = scmp.lt.u32.totalorder %s761_s11, %s757_s19  ;;  %p765_p12 = scmp.lt.u32.totalorder %s757_s19, %s914_s29 }
 0x10f   : > { %p759_p7 = pnand %p758_p4, %p874_p5 }
 0x110   : > { %p764_p11 = por %p763_p10, %p762_p9 }
 0x111   : > { %p760_p8 = pneg %p759_p7 }
 0x112   : > { %p766_p13 = por %p765_p12, %p764_p11 }
 0x114   : > { %p767_p0 = pnand %p766_p13, %p760_p8 }
 0x116   : > { %770 = shalt.err (!%p767_p0)
}
 0x117   : > { %701 = dma.vmem_to_hbm [thread:$0]  (%p874_p5), %s519_s22, 128, %s914_s29, %s497_s30   ;;  %vm489_vm8 = vcmask 7168  }
 0x118   : > { %s638_s14 = sshll.u32 %s886_s27, 3 }
 0x119   : > { %s212_s28 = scalar_lea.vmem %s960_s3, %s638_s14  ;;  %s216_s7 = scalar_lea.vmem %s961_s4, %s638_s14 }
 0x193   : > { %v488_v31 = vpop.xlane.xlu0 %487 }
 0x194   : > { %490 = vst.msk [vmem:[%s212_s28] sm:$0xff] %vm489_vm8, %v488_v31 }
 0x197   : > { %v494_v32 = vpop.xlane.xlu0 %493 }
 0x198   : > { %495 = vst.msk [vmem:[%s216_s7] sm:$0xff] %vm489_vm8, %v494_v32 }
 0x199 PF: > { %p707_p1 = scmp.ge.s32.totalorder %s805_s18, 2  ;;  %s536_s25 = sand.u32 1, %s793_s15  }
 0x19a   : > { %s537_s27 = scalar_lea.sflag [#allocation3], %s536_s25 }
 0x19b   : > { %p704_p5 = pnand %p707_p1, %p878_p6 }
 0x19d   : > { %788 = dma.done.wait (!%p704_p5), %s537_s27, 128  }
 0x19e   : > { %790 = vsyncadd (!%p704_p5), %s537_s27, 4294967168  ;;  %p15_p2 = scmp.ge.s32.totalorder %s861_s21, 4   ;;  %s964_s15 = smov %s797_s16 }
 0x19f   : > { %s965_s16 = smov %s801_s17  ;;  %s966_s17 = smov %s872_s24 }
 0x1a0   : > { %s967_s18 = smov %s861_s21  ;;  %17 = sbr.rel (!%p15_p2) target bundleno = 3 (0x3), region = 89 }
 0x1a7   :  { %556 = vsyncpa [#allocation3], 1 }
 0x1a8   :  { %558 = vsyncpa [#allocation3 + $0x1], 1 }

</bundles_post_ra>
